<compile_context>
chip_gen: v5e
topology: v5e:2x2
jax: 0.10.0
libtpu: 0.0.40
codegen_flags: <defaults>
</compile_context>

<pallas_src>
import numpy as np
import jax
import jax.numpy as jnp
from jax.experimental import pallas as pl
from jax.experimental.pallas import tpu as pltpu


def _probe_kernel(emb_ref, w_ref, dep_ref, dist_ref):
    x = emb_ref[...]                                   # (Bt, L, E)
    w = w_ref[...]                                     # (E, D)
    bt, seq_len, emb_dim = x.shape
    dep_dim = w.shape[1]

    # Fold batch into the MXU M dimension: (Bt*L, E) @ (E, D) -> (Bt*L, D).
    dep_flat = jnp.dot(x.reshape(bt * seq_len, emb_dim), w,
                       preferred_element_type=jnp.float32)
    dep = dep_flat.reshape(bt, seq_len, dep_dim)       # (Bt, L, D), f32
    dep_ref[...] = dep.astype(dep_ref.dtype)

    # distances[b, i, j] = ||dep[b,i]||^2 + ||dep[b,j]||^2 - 2 <dep[b,i], dep[b,j]>
    # The contraction over D runs on the MXU; the epilogue is O(L^2) VPU adds.
    sq = jnp.sum(dep * dep, axis=-1)                   # (Bt, L)
    gram = jnp.einsum("bld,bmd->blm", dep, dep,
                      preferred_element_type=jnp.float32)   # (Bt, L, L)
    dist = sq[:, :, None] + sq[:, None, :] - 2.0 * gram
    # Rounding can make the Gram form slightly negative; clamp for the decode.
    dist_ref[...] = jnp.maximum(dist, 0.0).astype(dist_ref.dtype)


def undirected_graph_predictor(emb_sentences, weight, *, block_b=None):
    """Returns (dep_embeddings [B,L,D] in input dtype, distances [B,L,L] f32)."""
    B, L, E = emb_sentences.shape
    D = weight.shape[1]

    if block_b is None:
        # Fold enough batch elements so Bt*L approaches the MXU M dimension,
        # while keeping the double-buffered per-step VMEM footprint bounded.
        target_rows = 256
        target = max(1, target_rows // max(L, 1))
        per_b_bytes = 4 * (L * E + L * D + L * L) * 2      # rough 2x-buffered
        vmem_budget = 24 * 1024 * 1024
        target = max(1, min(target, vmem_budget // max(per_b_bytes, 1)))
        block_b = 1
        for cand in range(min(target, B), 0, -1):
            if B % cand == 0:
                block_b = cand
                break

    grid = (B // block_b,)
    flops = 2 * B * L * E * D + 2 * B * L * L * D + 4 * B * L * L
    bytes_accessed = 4 * (B * L * E + E * D + B * L * D + B * L * L)

    dep, dist = pl.pallas_call(
        _probe_kernel,
        out_shape=(
            jax.ShapeDtypeStruct((B, L, D), emb_sentences.dtype),
            jax.ShapeDtypeStruct((B, L, L), jnp.float32),
        ),
        grid_spec=pltpu.PrefetchScalarGridSpec(
            num_scalar_prefetch=0,
            grid=grid,
            in_specs=[
                pl.BlockSpec((block_b, L, E), lambda b: (b, 0, 0)),
                pl.BlockSpec((E, D), lambda b: (0, 0)),
            ],
            out_specs=[
                pl.BlockSpec((block_b, L, D), lambda b: (b, 0, 0)),
                pl.BlockSpec((block_b, L, L), lambda b: (b, 0, 0)),
            ],
        ),
        compiler_params=pltpu.CompilerParams(
            dimension_semantics=("parallel",)),
        cost_estimate=pl.CostEstimate(
            flops=flops, transcendentals=0, bytes_accessed=bytes_accessed),
    )(emb_sentences, weight)
    return dep, dist


def to_edges(distances, mask):
    """Greedy Prim-style decode of the distance matrix into an undirected tree."""
    # TODO(synk): sequential, data-dependent list-based MST decode has no clean
    # Pallas equivalent; executed host-side in NumPy (matches torch loop exactly).
    distances = np.asarray(distances)
    mask = np.asarray(mask)
    graphs = np.full(mask.shape, -2, dtype=np.int64)
    for sidx in range(graphs.shape[0]):
        sen_len = int(mask[sidx].sum())
        graphs[sidx, 0] = -1
        tree_nodes = [0]
        free_nodes = [n for n in range(sen_len) if n != 0]
        while free_nodes:
            cur = distances[sidx][np.ix_(tree_nodes, free_nodes)]
            min_idx = int(np.argmin(cur))
            min_tree = tree_nodes[min_idx // len(free_nodes)]
            min_free = free_nodes[min_idx % len(free_nodes)]
            graphs[sidx, min_free] = min_tree
            tree_nodes.append(min_free)
            free_nodes.remove(min_free)
    return graphs


def structural_probe_forward(emb_sentences, att_sentences, weight, decode=True):
    """Mirror of StructuralProbe.forward given a pre-computed embedding.

    (The wrapped emb_model is external/frozen; emb_sentences / att_sentences
    stand in for its output, which StructuralProbe detaches anyway.)
    """
    dep, dist = undirected_graph_predictor(emb_sentences, weight)
    results = {"dependency_embeddings": dep, "distances": dist}
    if decode:
        results["graphs"] = to_edges(jax.device_get(dist),
                                     jax.device_get(att_sentences))
    return results


if __name__ == "__main__":
    B, L, E, D = 2, 8, 32, 16   # batch, max_len, embedding_dim, dep_dim

    key = jax.random.PRNGKey(0)
    k_emb, k_w = jax.random.split(key)
    emb_sentences = jax.random.normal(k_emb, (B, L, E), dtype=jnp.float32)
    # nn.Linear(E, D, bias=False) weight is [D, E]; keep kernel layout [E, D].
    weight = (jax.random.normal(k_w, (D, E), dtype=jnp.float32)
              * (1.0 / np.sqrt(E))).T
    att_sentences = jnp.ones((B, L), dtype=jnp.float32)   # full-length mask

    results = structural_probe_forward(emb_sentences, att_sentences, weight,
                                       decode=True)
    dep = jax.block_until_ready(results["dependency_embeddings"])
    dist = jax.block_until_ready(results["distances"])

    # Pure-JAX reference (same math as the torch module).
    dep_ref = jnp.einsum("ble,ed->bld", emb_sentences, weight)
    diff_ref = dep_ref[:, :, None, :] - dep_ref[:, None, :, :]
    dist_ref = jnp.sum(diff_ref ** 2, axis=-1)

    np.testing.assert_allclose(np.asarray(dep), np.asarray(dep_ref),
                               rtol=1e-5, atol=1e-5)
    np.testing.assert_allclose(np.asarray(dist), np.asarray(dist_ref),
                               rtol=1e-4, atol=1e-4)
    assert results["graphs"].shape == (B, L)
    assert (results["graphs"][:, 0] == -1).all()

    print("KERNEL_OK")
</pallas_src>

<mosaic_0001>
module attributes {stable_mosaic.version = 11 : i64} {
  func.func @_probe_kernel(%arg0: i32, %arg1: memref<2x8x32xf32, #tpu.memory_space<vmem>>, %arg2: memref<32x16xf32, #tpu.memory_space<vmem>>, %arg3: memref<2x8x16xf32, #tpu.memory_space<vmem>>, %arg4: memref<2x8x8xf32, #tpu.memory_space<vmem>>) attributes {dimension_semantics = [#tpu.dimension_semantics<parallel>], iteration_bounds = array<i64: 1>, scalar_prefetch = 0 : i64, scratch_operands = 0 : i64, tpu.core_type = #tpu.core_type<tc>, window_params = [{transform_indices = @transform_0, window_bounds = array<i64: 2, 8, 32>}, {pipeline_mode = #tpu.pipeline_mode<synchronous>, transform_indices = @transform_1, window_bounds = array<i64: 32, 16>}, {transform_indices = @transform_2, window_bounds = array<i64: 2, 8, 16>}, {transform_indices = @transform_3, window_bounds = array<i64: 2, 8, 8>}]} {
    %c0 = arith.constant 0 : index
    %c0_0 = arith.constant 0 : index
    %c0_1 = arith.constant 0 : index
    %0 = vector.load %arg1[%c0, %c0_0, %c0_1] : memref<2x8x32xf32, #tpu.memory_space<vmem>>, vector<2x8x32xf32>
    %c0_2 = arith.constant 0 : index
    %c0_3 = arith.constant 0 : index
    %1 = vector.load %arg2[%c0_2, %c0_3] : memref<32x16xf32, #tpu.memory_space<vmem>>, vector<32x16xf32>
    %2 = vector.shape_cast %0 : vector<2x8x32xf32> to vector<16x32xf32>
    %cst = arith.constant dense<0.000000e+00> : vector<16x16xf32>
    %3 = tpu.matmul %2, %1, %cst {dimension_numbers = #tpu.dot_dimension_numbers<[1], [0], [0], [1], [0, 0, 1, 1], [], []>} : vector<16x32xf32>, vector<32x16xf32>, vector<16x16xf32> -> vector<16x16xf32>
    %4 = vector.shape_cast %3 : vector<16x16xf32> to vector<2x8x16xf32>
    %c0_4 = arith.constant 0 : index
    %c0_5 = arith.constant 0 : index
    %c0_6 = arith.constant 0 : index
    %5 = vector.load %arg3[%c0_4, %c0_5, %c0_6] : memref<2x8x16xf32, #tpu.memory_space<vmem>>, vector<2x8x16xf32>
    tpu.vector_store %arg3[%c0_4, %c0_5, %c0_6], %4 {strides = array<i32>} : memref<2x8x16xf32, #tpu.memory_space<vmem>>, vector<2x8x16xf32>,
    %6 = arith.mulf %4, %4 : vector<2x8x16xf32>
    %cst_7 = arith.constant dense<0.000000e+00> : vector<2x8xf32>
    %7 = vector.multi_reduction <add>, %6, %cst_7 [2] : vector<2x8x16xf32> to vector<2x8xf32>
    "tpu.trace_start"() <{level = 10 : i32, message = "bld,bmd->blm"}> : () -> ()
    %cst_8 = arith.constant dense<0.000000e+00> : vector<2x8x8xf32>
    %8 = tpu.matmul %4, %4, %cst_8 {dimension_numbers = #tpu.dot_dimension_numbers<[2], [2], [1], [1], [0, 0, 0, 1, 1, 1], [0], [0]>} : vector<2x8x16xf32>, vector<2x8x16xf32>, vector<2x8x8xf32> -> vector<2x8x8xf32>
    "tpu.trace_stop"() : () -> ()
    %9 = vector.shape_cast %7 : vector<2x8xf32> to vector<2x8x1xf32>
    %10 = vector.shape_cast %7 : vector<2x8xf32> to vector<2x1x8xf32>
    %11 = vector.broadcast %9 : vector<2x8x1xf32> to vector<2x8x8xf32>
    %12 = vector.broadcast %10 : vector<2x1x8xf32> to vector<2x8x8xf32>
    %13 = arith.addf %11, %12 : vector<2x8x8xf32>
    %cst_9 = arith.constant 2.000000e+00 : f32
    %14 = vector.broadcast %cst_9 : f32 to vector<2x8x8xf32>
    %15 = arith.mulf %14, %8 : vector<2x8x8xf32>
    %16 = arith.subf %13, %15 : vector<2x8x8xf32>
    %cst_10 = arith.constant 0.000000e+00 : f32
    %17 = vector.broadcast %cst_10 : f32 to vector<2x8x8xf32>
    %18 = arith.maximumf %16, %17 : vector<2x8x8xf32>
    %c0_11 = arith.constant 0 : index
    %c0_12 = arith.constant 0 : index
    %c0_13 = arith.constant 0 : index
    %19 = vector.load %arg4[%c0_11, %c0_12, %c0_13] : memref<2x8x8xf32, #tpu.memory_space<vmem>>, vector<2x8x8xf32>
    tpu.vector_store %arg4[%c0_11, %c0_12, %c0_13], %18 {strides = array<i32>} : memref<2x8x8xf32, #tpu.memory_space<vmem>>, vector<2x8x8xf32>,
    return
  }
  func.func @transform_0(%arg0: i32) -> (i32, i32, i32) {
    %c0_i32 = arith.constant 0 : i32
    %c0_i32_0 = arith.constant 0 : i32
    %c0_i32_1 = arith.constant 0 : i32
    return %arg0, %c0_i32, %c0_i32_0 : i32, i32, i32
  }
  func.func @transform_1(%arg0: i32) -> (i32, i32) {
    %c0_i32 = arith.constant 0 : i32
    %c0_i32_0 = arith.constant 0 : i32
    %c0_i32_1 = arith.constant 0 : i32
    return %c0_i32, %c0_i32_0 : i32, i32
  }
  func.func @transform_2(%arg0: i32) -> (i32, i32, i32) {
    %c0_i32 = arith.constant 0 : i32
    %c0_i32_0 = arith.constant 0 : i32
    %c0_i32_1 = arith.constant 0 : i32
    return %arg0, %c0_i32, %c0_i32_0 : i32, i32, i32
  }
  func.func @transform_3(%arg0: i32) -> (i32, i32, i32) {
    %c0_i32 = arith.constant 0 : i32
    %c0_i32_0 = arith.constant 0 : i32
    %c0_i32_1 = arith.constant 0 : i32
    return %arg0, %c0_i32, %c0_i32_0 : i32, i32, i32
  }
}

</mosaic_0001>

<bundles_post_ra>
// kernel: tpu_custom_call.1
= control target key start
LH: loop header
LB: loop body
LE: loop exit
PB: predicated region body
PF: predicated region fallthrough
CT: control target
= control target key end

     0   :  { %9 = vsyncpa [#allocation3], 0  ;;  %s301_s0 = inlined_call_operand.vmem [shape: f32[2,8,32], index: 0, kind: input, shape index: {}]   ;;  %s302_s1 = inlined_call_operand.vmem [shape: f32[32,16], index: 1, kind: input, shape index: {}]   ;;  %s303_s2 = inlined_call_operand.hbm [shape: f32[2,8,16], index: 2, kind: output, shape index: {0}]   ;;  %s304_s3 = inlined_call_operand.hbm [shape: f32[2,8,8], index: 3, kind: output, shape index: {1}]  }
   0x1   :  { %v20_v0 = vld [vmem:[%s302_s1 + $0x18] sm:$0xff]  ;;  %v19_v1 = vld [vmem:[%s302_s1 + $0x10] sm:$0xff]  ;;  %v18_v2 = vld [vmem:[%s302_s1 + $0x8] sm:$0xff] }
   0x2   :  { %40 = vmatpush.msra.mxu0 %v20_v0  ;;  %187 = vmatpush.msra.mxu3 %v20_v0 }
   0x3   :  { %10 = vsyncpa [#allocation5], 0  ;;  %v17_v3 = vld [vmem:[%s302_s1] sm:$0xff]  ;;  %vm21_vm0 = vcmask 261120   ;;  %v16_v5 = vld [vmem:[%s301_s0 + $0x8] sm:$0xff]  ;;  %vm51_vm1 = vcmask 130048   ;;  %v110_v12 = vlaneseq }
   0x4   :  { %41 = vmatpush.msra.mxu0 %v19_v1  ;;  %188 = vmatpush.msra.mxu3 %v19_v1  ;;  %v15_v4 = vld [vmem:[%s301_s0] sm:$0xff]  ;;  %s247_s0 = smov [#allocation2]   ;;  %s151_s26 = sshll.u32 %s303_s2, 4  ;;  %vm142_vm2 = vcmask 64512   ;;  %s152_s26 = int_to_ptr.hbm [resolvable:$true] %s151_s26 }
   0x5   :  { %s149_s1 = sshll.u32 %s247_s0, 4  ;;  %s248_s27 = smov 128   ;;  %v111_v13 = vand.u32 127, %v110_v12  ;;  %s150_s1 = int_to_ptr.vmem [resolvable:$true] %s149_s1 }
   0x6   :  { %42 = vmatpush.msra.mxu0 %v18_v2  ;;  %189 = vmatpush.msra.mxu3 %v18_v2  ;;  %s249_s28 = smov 8   ;;  %s250_s2 = smov [#allocation4]  }
   0x7   :  { %s162_s29 = sshll.u32 %s250_s2, 4  ;;  %s164_s5 = sshll.u32 %s304_s3, 4  ;;  %s163_s29 = int_to_ptr.vmem [resolvable:$true] %s162_s29  ;;  %s165_s5 = int_to_ptr.hbm [resolvable:$true] %s164_s5 }
   0x8   :  { %43 = vmatpush.msra.mxu0 %v17_v3  ;;  %190 = vmatpush.msra.mxu3 %v17_v3 }
   0x9   :  { %181 = vmatmul.msk.f32.vlgmr.msra.gmra.mxu0 %vm21_vm0, %v15_v4  ;;  %182 = vmatmul.msk.f32.vlgmr.msra.gmra.mxu3 %vm21_vm0, %v16_v5 }
  0x86   :  { %v45_v6 = vpop.f32.mrf.mxu0 }
  0x87   :  { %52 = vst.msk [vmem:[#allocation2] sm:$0xff] %vm51_vm1, %v45_v6  ;;  %183 = vmatpush.xpose.msk.msra.mxu1 %vm51_vm1, %v45_v6  ;;  %v54_v7 = vmul.f32 %v45_v6, %v45_v6 }
  0x89   :  { %v56_v8 = vsel %vm51_vm1, %v54_v7, 0.0 }
  0x8a   :  { %57 = vadd.xlane.f32.xlu0 %v56_v8  ;;  %184 = vmatmul.msk.f32.vlgmr.msra.gmra.mxu1 %vm51_vm1, %v45_v6 }
  0x8c   :  { %v48_v9 = vpop.f32.mrf.mxu3 }
  0x8d   :  { %53 = vst.msk [vmem:[#allocation2 + $0x8] sm:$0xff] %vm51_vm1, %v48_v9  ;;  %185 = vmatpush.xpose.msk.msra.mxu2 %vm51_vm1, %v48_v9  ;;  %v55_v10 = vmul.f32 %v48_v9, %v48_v9 }
  0x8e   :  { %157 = dma.vmem_to_hbm [thread:$0]  %s150_s1, 256, %s152_s26, [#allocation3], %s248_s27, %s248_s27, %s249_s28  }
  0x8f   :  { %v59_v11 = vsel %vm51_vm1, %v55_v10, 0.0 }
  0x90   :  { %186 = vmatmul.msk.f32.vlgmr.msra.gmra.mxu2 %vm51_vm1, %v48_v9 }
  0x92   :  { %60 = vadd.xlane.f32.xlu0 %v59_v11 }
  0xfd   :  { %v58_v14 = vpop.xlane.xlu0 %57 }
  0xfe   :  { %v112_v15 = vperm.slane %v58_v14, %v111_v13 }
 0x100   :  { %v134_v16 = vadd.f32 %v112_v15, %v58_v14 }
 0x105   :  { %v61_v21 = vpop.xlane.xlu0 %60 }
 0x106   :  { %v113_v22 = vperm.slane %v61_v21, %v111_v13 }
 0x107   :  { %v82_v17 = vpop.f32.mrf.mxu1 }
 0x108   :  { %v136_v18 = vmul.f32 2.0, %v82_v17  ;;  %v135_v24 = vadd.f32 %v113_v22, %v61_v21 }
 0x10a   :  { %v138_v19 = vsub.f32 %v134_v16, %v136_v18 }
 0x10c   :  { %v140_v20 = vmax.f32 %v138_v19, 0.0 }
 0x10e   :  { %143 = vst.msk [vmem:[#allocation4] sm:$0xff] %vm142_vm2, %v140_v20 }
 0x113   :  { %v105_v23 = vpop.f32.mrf.mxu2 }
 0x114   :  { %v137_v25 = vmul.f32 2.0, %v105_v23 }
 0x116   :  { %v139_v26 = vsub.f32 %v135_v24, %v137_v25 }
 0x118   :  { %v141_v27 = vmax.f32 %v139_v26, 0.0 }
 0x11a   :  { %144 = vst.msk [vmem:[#allocation4 + $0x8] sm:$0xff] %vm142_vm2, %v141_v27 }
 0x11b   :  { %170 = dma.vmem_to_hbm [thread:$0]  %s163_s29, 256, %s165_s5, [#allocation5], %s248_s27, %s248_s27, %s249_s28  }
 0x11c   :  { %243 = dma.done.wait [#allocation3], 256  }
 0x11d   :  { %244 = vsyncadd [#allocation3], 4294967040 }
 0x11e   :  { %245 = dma.done.wait [#allocation5], 256  }
 0x11f   :  { %246 = vsyncadd [#allocation5], 4294967040 }
 0x120   :  { %179 = vsyncpa [#allocation3], 1 }
 0x121   :  { %180 = vsyncpa [#allocation5], 1 }

</bundles_post_ra>
